<compile_context>
chip_gen: v7x
topology: tpu7x:2x2x1
jax: 0.10.0
libtpu: 0.0.40
codegen_flags: <defaults>
</compile_context>

<pallas_src>
import functools

import jax
import jax.numpy as jnp
import numpy as np
from jax.experimental import pallas as pl
from jax.experimental.pallas import tpu as pltpu

BN_EPS = 1e-5   # nn.BatchNorm1d default eps
LANE = 128      # TPU lane width: pad feature dims to a multiple of 128


def _round_up(x, m):
    return (x + m - 1) // m * m


def _vmem_spec():
    return pl.BlockSpec(memory_space=pltpu.MemorySpace.VMEM)


def _fused_gconv_kernel(adj_ref, pool_ref, x_ref,
                        w1_ref, b1_ref, w2_ref, b2_ref, gamma_ref, beta_ref,
                        z_ref, g_ref, *, num_layers, hp):
    """All GIN layers + ReLU + BatchNorm + global_add_pool in one kernel.

    adj_ref:  [N, N]  bf16   dense adjacency, A[dst, src] = edge multiplicity
    pool_ref: [G, N]  bf16   P[g, n] = 1[batch[n] == g]
    x_ref:    [N, HP] f32    zero-padded node features
    w*/b*/gamma/beta: stacked per-layer params, [L, HP, HP] / [L, 1, HP]
    z_ref:    [N, L*HP] f32  concatenated per-layer node embeddings (padded)
    g_ref:    [G, L*HP] f32  concatenated pooled graph embeddings (padded)
    """
    # A / P are read from HBM exactly once (bf16) and reused for every layer.
    a = adj_ref[...].astype(jnp.float32)      # [N, N]
    p = pool_ref[...].astype(jnp.float32)     # [G, N]
    z = x_ref[...]                            # [N, HP]

    for l in range(num_layers):               # tiny static loop -> fully unrolled
        # GIN aggregation: agg[i] = sum_{(j -> i) in E} z[j]  ==  A @ z   (MXU)
        agg = jnp.dot(a, z, preferred_element_type=jnp.float32)
        h = z + agg                           # (1 + eps) * x + agg, eps = 0 default
        # MLP: Linear -> ReLU -> Linear
        h = jnp.dot(h, w1_ref[l], preferred_element_type=jnp.float32) + b1_ref[l]
        h = jnp.maximum(h, 0.0)
        h = jnp.dot(h, w2_ref[l], preferred_element_type=jnp.float32) + b2_ref[l]
        # F.relu after the conv
        h = jnp.maximum(h, 0.0)
        # BatchNorm1d over the node axis (fresh module => training mode =>
        # biased batch statistics) + learnable affine.
        mean = jnp.mean(h, axis=0, keepdims=True)
        var = jnp.mean(jnp.square(h - mean), axis=0, keepdims=True)
        z = (h - mean) * jax.lax.rsqrt(var + BN_EPS) * gamma_ref[l] + beta_ref[l]
        # Lane-dense (128-wide) stores into the concatenated outputs; pooling is
        # fused here so z_cat never round-trips through HBM.
        z_ref[:, l * hp:(l + 1) * hp] = z
        g_ref[:, l * hp:(l + 1) * hp] = jnp.dot(
            p, z, preferred_element_type=jnp.float32)


def init_gconv_params(key, input_dim, hidden_dim, num_layers):
    """Deterministic synthetic parameters mirroring GConv.__init__ shapes."""
    params = []
    for i in range(num_layers):
        d_in = input_dim if i == 0 else hidden_dim
        key, k1, k2 = jax.random.split(key, 3)
        w1 = jax.random.normal(k1, (d_in, hidden_dim), jnp.float32) * 0.1
        b1 = jnp.zeros((1, hidden_dim), jnp.float32)
        w2 = jax.random.normal(k2, (hidden_dim, hidden_dim), jnp.float32) * 0.1
        b2 = jnp.zeros((1, hidden_dim), jnp.float32)
        gamma = jnp.ones((1, hidden_dim), jnp.float32)   # BatchNorm1d weight init
        beta = jnp.zeros((1, hidden_dim), jnp.float32)   # BatchNorm1d bias init
        params.append((w1, b1, w2, b2, gamma, beta))
    # NOTE: the PyTorch module also constructs `self.project`, but it is never
    # used in forward(), so it is intentionally not materialized here.
    return params


def gconv_forward(params, x, edge_index, batch, num_graphs):
    n, input_dim = x.shape
    num_layers = len(params)
    hidden_dim = params[0][0].shape[1]
    hp = _round_up(hidden_dim, LANE)
    assert _round_up(input_dim, LANE) <= hp, "input_dim padding must fit hidden padding"

    # --- glue (plain JAX): dense adjacency + pooling one-hot, shipped as bf16 ---
    adj = jnp.zeros((n, n), jnp.float32).at[edge_index[1], edge_index[0]].add(1.0)
    adj = adj.astype(jnp.bfloat16)                       # exact for counts <= 256
    pool_mat = (batch[None, :] == jnp.arange(num_graphs)[:, None]).astype(jnp.bfloat16)

    # Zero-pad features / weights so every matmul is lane-dense and all layers
    # share one stacked [L, HP, HP] weight tensor (padding is exact).
    x_p = jnp.zeros((n, hp), jnp.float32).at[:, :input_dim].set(x)

    def pad_mat(w):
        return jnp.zeros((hp, hp), jnp.float32).at[:w.shape[0], :w.shape[1]].set(w)

    def pad_vec(v):
        v = v.reshape(1, -1)
        return jnp.zeros((1, hp), jnp.float32).at[:, :v.shape[1]].set(v)

    w1_s = jnp.stack([pad_mat(pr[0]) for pr in params])
    b1_s = jnp.stack([pad_vec(pr[1]) for pr in params])
    w2_s = jnp.stack([pad_mat(pr[2]) for pr in params])
    b2_s = jnp.stack([pad_vec(pr[3]) for pr in params])
    gamma_s = jnp.stack([pad_vec(pr[4]) for pr in params])
    beta_s = jnp.stack([pad_vec(pr[5]) for pr in params])

    kernel = functools.partial(_fused_gconv_kernel, num_layers=num_layers, hp=hp)
    z_p, g_p = pl.pallas_call(
        kernel,
        out_shape=(
            jax.ShapeDtypeStruct((n, num_layers * hp), jnp.float32),
            jax.ShapeDtypeStruct((num_graphs, num_layers * hp), jnp.float32),
        ),
        in_specs=[_vmem_spec()] * 9,
        out_specs=(_vmem_spec(), _vmem_spec()),
    )(adj, pool_mat, x_p, w1_s, b1_s, w2_s, b2_s, gamma_s, beta_s)

    # Drop the lane padding: [*, L*HP] -> [*, L, HP] -> [*, L, H] -> [*, L*H].
    def unpad(y):
        m = y.shape[0]
        return y.reshape(m, num_layers, hp)[:, :, :hidden_dim].reshape(
            m, num_layers * hidden_dim)

    return unpad(z_p), unpad(g_p)


def gconv_reference(params, x, edge_index, batch, num_graphs):
    """Pure-JAX reference with the original (unpadded, f32) formulation."""
    n = x.shape[0]
    adj = jnp.zeros((n, n), jnp.float32).at[edge_index[1], edge_index[0]].add(1.0)
    pool = (batch[None, :] == jnp.arange(num_graphs)[:, None]).astype(jnp.float32)
    z = x
    zs = []
    for (w1, b1, w2, b2, gamma, beta) in params:
        h = z + adj @ z
        h = jnp.maximum(h @ w1 + b1, 0.0)
        h = jnp.maximum(h @ w2 + b2, 0.0)
        mean = h.mean(axis=0, keepdims=True)
        var = jnp.mean(jnp.square(h - mean), axis=0, keepdims=True)
        z = (h - mean) * jax.lax.rsqrt(var + BN_EPS) * gamma + beta
        zs.append(z)
    z_cat = jnp.concatenate(zs, axis=1)
    g_cat = pool @ z_cat
    return z_cat, g_cat


if __name__ == "__main__":
    input_dim, hidden_dim, num_layers = 8, 32, 3
    n_nodes, n_edges, num_graphs = 16, 40, 2

    key = jax.random.PRNGKey(0)
    kx, ksrc, kdst = jax.random.split(key, 3)
    x = jax.random.normal(kx, (n_nodes, input_dim), jnp.float32)
    src = jax.random.randint(ksrc, (n_edges,), 0, n_nodes, dtype=jnp.int32)
    dst = jax.random.randint(kdst, (n_edges,), 0, n_nodes, dtype=jnp.int32)
    edge_index = jnp.stack([src, dst], axis=0)            # [2, E], row0=src, row1=dst
    batch = jnp.concatenate([
        jnp.zeros(n_nodes // 2, jnp.int32),
        jnp.ones(n_nodes - n_nodes // 2, jnp.int32),
    ])                                                    # [N] graph ids

    params = init_gconv_params(jax.random.PRNGKey(42), input_dim, hidden_dim,
                               num_layers)

    fwd = jax.jit(gconv_forward, static_argnums=(4,))
    z, g = fwd(params, x, edge_index, batch, num_graphs)
    jax.block_until_ready((z, g))
    assert z.shape == (n_nodes, hidden_dim * num_layers)
    assert g.shape == (num_graphs, hidden_dim * num_layers)

    # Correctness vs pure-JAX reference (loose tol: MXU reduced-precision passes).
    z_ref, g_ref = gconv_reference(params, x, edge_index, batch, num_graphs)
    np.testing.assert_allclose(np.asarray(z), np.asarray(z_ref), rtol=3e-2, atol=3e-2)
    np.testing.assert_allclose(np.asarray(g), np.asarray(g_ref), rtol=3e-2, atol=3e-2)

    print("KERNEL_OK")
</pallas_src>

<mosaic_0001>
module attributes {stable_mosaic.version = 11 : i64} {
  func.func @_fused_gconv_kernel(%arg0: memref<16x16xbf16, #tpu.memory_space<vmem>>, %arg1: memref<2x16xbf16, #tpu.memory_space<vmem>>, %arg2: memref<16x128xf32, #tpu.memory_space<vmem>>, %arg3: memref<3x128x128xf32, #tpu.memory_space<vmem>>, %arg4: memref<3x1x128xf32, #tpu.memory_space<vmem>>, %arg5: memref<3x128x128xf32, #tpu.memory_space<vmem>>, %arg6: memref<3x1x128xf32, #tpu.memory_space<vmem>>, %arg7: memref<3x1x128xf32, #tpu.memory_space<vmem>>, %arg8: memref<3x1x128xf32, #tpu.memory_space<vmem>>, %arg9: memref<16x384xf32, #tpu.memory_space<vmem>>, %arg10: memref<2x384xf32, #tpu.memory_space<vmem>>) attributes {dimension_semantics = [], scalar_prefetch = 0 : i64, scratch_operands = 0 : i64, tpu.core_type = #tpu.core_type<tc>} {
    %c0 = arith.constant 0 : index
    %c0_0 = arith.constant 0 : index
    %0 = vector.load %arg0[%c0, %c0_0] : memref<16x16xbf16, #tpu.memory_space<vmem>>, vector<16x16xbf16>
    %1 = arith.extf %0 : vector<16x16xbf16> to vector<16x16xf32>
    %c0_1 = arith.constant 0 : index
    %c0_2 = arith.constant 0 : index
    %2 = vector.load %arg1[%c0_1, %c0_2] : memref<2x16xbf16, #tpu.memory_space<vmem>>, vector<2x16xbf16>
    %3 = arith.extf %2 : vector<2x16xbf16> to vector<2x16xf32>
    %c0_3 = arith.constant 0 : index
    %c0_4 = arith.constant 0 : index
    %4 = vector.load %arg2[%c0_3, %c0_4] : memref<16x128xf32, #tpu.memory_space<vmem>>, vector<16x128xf32>
    %cst = arith.constant dense<0.000000e+00> : vector<16x128xf32>
    %5 = tpu.matmul %1, %4, %cst {dimension_numbers = #tpu.dot_dimension_numbers<[1], [0], [0], [1], [0, 0, 1, 1], [], []>} : vector<16x16xf32>, vector<16x128xf32>, vector<16x128xf32> -> vector<16x128xf32>
    %6 = arith.addf %4, %5 : vector<16x128xf32>
    %c0_5 = arith.constant 0 : index
    %c0_6 = arith.constant 0 : index
    %c0_7 = arith.constant 0 : index
    %7 = vector.load %arg3[%c0_5, %c0_6, %c0_7] : memref<3x128x128xf32, #tpu.memory_space<vmem>>, vector<1x128x128xf32>
    %8 = vector.shape_cast %7 : vector<1x128x128xf32> to vector<128x128xf32>
    %cst_8 = arith.constant dense<0.000000e+00> : vector<16x128xf32>
    %9 = tpu.matmul %6, %8, %cst_8 {dimension_numbers = #tpu.dot_dimension_numbers<[1], [0], [0], [1], [0, 0, 1, 1], [], []>} : vector<16x128xf32>, vector<128x128xf32>, vector<16x128xf32> -> vector<16x128xf32>
    %c0_9 = arith.constant 0 : index
    %c0_10 = arith.constant 0 : index
    %c0_11 = arith.constant 0 : index
    %10 = vector.load %arg4[%c0_9, %c0_10, %c0_11] : memref<3x1x128xf32, #tpu.memory_space<vmem>>, vector<1x1x128xf32>
    %11 = vector.shape_cast %10 : vector<1x1x128xf32> to vector<1x128xf32>
    %12 = vector.broadcast %11 : vector<1x128xf32> to vector<16x128xf32>
    %13 = arith.addf %9, %12 : vector<16x128xf32>
    %cst_12 = arith.constant 0.000000e+00 : f32
    %14 = vector.broadcast %cst_12 : f32 to vector<16x128xf32>
    %15 = arith.maximumf %13, %14 : vector<16x128xf32>
    %c0_13 = arith.constant 0 : index
    %c0_14 = arith.constant 0 : index
    %c0_15 = arith.constant 0 : index
    %16 = vector.load %arg5[%c0_13, %c0_14, %c0_15] : memref<3x128x128xf32, #tpu.memory_space<vmem>>, vector<1x128x128xf32>
    %17 = vector.shape_cast %16 : vector<1x128x128xf32> to vector<128x128xf32>
    %cst_16 = arith.constant dense<0.000000e+00> : vector<16x128xf32>
    %18 = tpu.matmul %15, %17, %cst_16 {dimension_numbers = #tpu.dot_dimension_numbers<[1], [0], [0], [1], [0, 0, 1, 1], [], []>} : vector<16x128xf32>, vector<128x128xf32>, vector<16x128xf32> -> vector<16x128xf32>
    %c0_17 = arith.constant 0 : index
    %c0_18 = arith.constant 0 : index
    %c0_19 = arith.constant 0 : index
    %19 = vector.load %arg6[%c0_17, %c0_18, %c0_19] : memref<3x1x128xf32, #tpu.memory_space<vmem>>, vector<1x1x128xf32>
    %20 = vector.shape_cast %19 : vector<1x1x128xf32> to vector<1x128xf32>
    %21 = vector.broadcast %20 : vector<1x128xf32> to vector<16x128xf32>
    %22 = arith.addf %18, %21 : vector<16x128xf32>
    %cst_20 = arith.constant 0.000000e+00 : f32
    %23 = vector.broadcast %cst_20 : f32 to vector<16x128xf32>
    %24 = arith.maximumf %22, %23 : vector<16x128xf32>
    %cst_21 = arith.constant dense<0.000000e+00> : vector<128xf32>
    %25 = vector.multi_reduction <add>, %24, %cst_21 [0] : vector<16x128xf32> to vector<128xf32>
    %26 = vector.shape_cast %25 : vector<128xf32> to vector<1x128xf32>
    %cst_22 = arith.constant 1.600000e+01 : f32
    %27 = vector.broadcast %cst_22 : f32 to vector<1x128xf32>
    %28 = arith.divf %26, %27 : vector<1x128xf32>
    %29 = vector.broadcast %28 : vector<1x128xf32> to vector<16x128xf32>
    %30 = arith.subf %24, %29 : vector<16x128xf32>
    %31 = arith.mulf %30, %30 : vector<16x128xf32>
    %cst_23 = arith.constant dense<0.000000e+00> : vector<128xf32>
    %32 = vector.multi_reduction <add>, %31, %cst_23 [0] : vector<16x128xf32> to vector<128xf32>
    %33 = vector.shape_cast %32 : vector<128xf32> to vector<1x128xf32>
    %cst_24 = arith.constant 1.600000e+01 : f32
    %34 = vector.broadcast %cst_24 : f32 to vector<1x128xf32>
    %35 = arith.divf %33, %34 : vector<1x128xf32>
    %36 = vector.broadcast %28 : vector<1x128xf32> to vector<16x128xf32>
    %37 = arith.subf %24, %36 : vector<16x128xf32>
    %cst_25 = arith.constant 9.99999974E-6 : f32
    %38 = vector.broadcast %cst_25 : f32 to vector<1x128xf32>
    %39 = arith.addf %35, %38 : vector<1x128xf32>
    %40 = math.rsqrt %39 : vector<1x128xf32>
    %41 = vector.broadcast %40 : vector<1x128xf32> to vector<16x128xf32>
    %42 = arith.mulf %37, %41 : vector<16x128xf32>
    %c0_26 = arith.constant 0 : index
    %c0_27 = arith.constant 0 : index
    %c0_28 = arith.constant 0 : index
    %43 = vector.load %arg7[%c0_26, %c0_27, %c0_28] : memref<3x1x128xf32, #tpu.memory_space<vmem>>, vector<1x1x128xf32>
    %44 = vector.shape_cast %43 : vector<1x1x128xf32> to vector<1x128xf32>
    %45 = vector.broadcast %44 : vector<1x128xf32> to vector<16x128xf32>
    %46 = arith.mulf %42, %45 : vector<16x128xf32>
    %c0_29 = arith.constant 0 : index
    %c0_30 = arith.constant 0 : index
    %c0_31 = arith.constant 0 : index
    %47 = vector.load %arg8[%c0_29, %c0_30, %c0_31] : memref<3x1x128xf32, #tpu.memory_space<vmem>>, vector<1x1x128xf32>
    %48 = vector.shape_cast %47 : vector<1x1x128xf32> to vector<1x128xf32>
    %49 = vector.broadcast %48 : vector<1x128xf32> to vector<16x128xf32>
    %50 = arith.addf %46, %49 : vector<16x128xf32>
    %c0_32 = arith.constant 0 : index
    %c0_33 = arith.constant 0 : index
    %51 = vector.load %arg9[%c0_32, %c0_33] : memref<16x384xf32, #tpu.memory_space<vmem>>, vector<16x128xf32>
    tpu.vector_store %arg9[%c0_32, %c0_33], %50 {strides = array<i32>} : memref<16x384xf32, #tpu.memory_space<vmem>>, vector<16x128xf32>,
    %cst_34 = arith.constant dense<0.000000e+00> : vector<2x128xf32>
    %52 = tpu.matmul %3, %50, %cst_34 {dimension_numbers = #tpu.dot_dimension_numbers<[1], [0], [0], [1], [0, 0, 1, 1], [], []>} : vector<2x16xf32>, vector<16x128xf32>, vector<2x128xf32> -> vector<2x128xf32>
    %c0_35 = arith.constant 0 : index
    %c0_36 = arith.constant 0 : index
    %53 = vector.load %arg10[%c0_35, %c0_36] : memref<2x384xf32, #tpu.memory_space<vmem>>, vector<2x128xf32>
    tpu.vector_store %arg10[%c0_35, %c0_36], %52 {strides = array<i32>} : memref<2x384xf32, #tpu.memory_space<vmem>>, vector<2x128xf32>,
    %cst_37 = arith.constant dense<0.000000e+00> : vector<16x128xf32>
    %54 = tpu.matmul %1, %50, %cst_37 {dimension_numbers = #tpu.dot_dimension_numbers<[1], [0], [0], [1], [0, 0, 1, 1], [], []>} : vector<16x16xf32>, vector<16x128xf32>, vector<16x128xf32> -> vector<16x128xf32>
    %55 = arith.addf %50, %54 : vector<16x128xf32>
    %c1 = arith.constant 1 : index
    %c0_38 = arith.constant 0 : index
    %c0_39 = arith.constant 0 : index
    %56 = vector.load %arg3[%c1, %c0_38, %c0_39] : memref<3x128x128xf32, #tpu.memory_space<vmem>>, vector<1x128x128xf32>
    %57 = vector.shape_cast %56 : vector<1x128x128xf32> to vector<128x128xf32>
    %cst_40 = arith.constant dense<0.000000e+00> : vector<16x128xf32>
    %58 = tpu.matmul %55, %57, %cst_40 {dimension_numbers = #tpu.dot_dimension_numbers<[1], [0], [0], [1], [0, 0, 1, 1], [], []>} : vector<16x128xf32>, vector<128x128xf32>, vector<16x128xf32> -> vector<16x128xf32>
    %c1_41 = arith.constant 1 : index
    %c0_42 = arith.constant 0 : index
    %c0_43 = arith.constant 0 : index
    %59 = vector.load %arg4[%c1_41, %c0_42, %c0_43] : memref<3x1x128xf32, #tpu.memory_space<vmem>>, vector<1x1x128xf32>
    %60 = vector.shape_cast %59 : vector<1x1x128xf32> to vector<1x128xf32>
    %61 = vector.broadcast %60 : vector<1x128xf32> to vector<16x128xf32>
    %62 = arith.addf %58, %61 : vector<16x128xf32>
    %cst_44 = arith.constant 0.000000e+00 : f32
    %63 = vector.broadcast %cst_44 : f32 to vector<16x128xf32>
    %64 = arith.maximumf %62, %63 : vector<16x128xf32>
    %c1_45 = arith.constant 1 : index
    %c0_46 = arith.constant 0 : index
    %c0_47 = arith.constant 0 : index
    %65 = vector.load %arg5[%c1_45, %c0_46, %c0_47] : memref<3x128x128xf32, #tpu.memory_space<vmem>>, vector<1x128x128xf32>
    %66 = vector.shape_cast %65 : vector<1x128x128xf32> to vector<128x128xf32>
    %cst_48 = arith.constant dense<0.000000e+00> : vector<16x128xf32>
    %67 = tpu.matmul %64, %66, %cst_48 {dimension_numbers = #tpu.dot_dimension_numbers<[1], [0], [0], [1], [0, 0, 1, 1], [], []>} : vector<16x128xf32>, vector<128x128xf32>, vector<16x128xf32> -> vector<16x128xf32>
    %c1_49 = arith.constant 1 : index
    %c0_50 = arith.constant 0 : index
    %c0_51 = arith.constant 0 : index
    %68 = vector.load %arg6[%c1_49, %c0_50, %c0_51] : memref<3x1x128xf32, #tpu.memory_space<vmem>>, vector<1x1x128xf32>
    %69 = vector.shape_cast %68 : vector<1x1x128xf32> to vector<1x128xf32>
    %70 = vector.broadcast %69 : vector<1x128xf32> to vector<16x128xf32>
    %71 = arith.addf %67, %70 : vector<16x128xf32>
    %cst_52 = arith.constant 0.000000e+00 : f32
    %72 = vector.broadcast %cst_52 : f32 to vector<16x128xf32>
    %73 = arith.maximumf %71, %72 : vector<16x128xf32>
    %cst_53 = arith.constant dense<0.000000e+00> : vector<128xf32>
    %74 = vector.multi_reduction <add>, %73, %cst_53 [0] : vector<16x128xf32> to vector<128xf32>
    %75 = vector.shape_cast %74 : vector<128xf32> to vector<1x128xf32>
    %cst_54 = arith.constant 1.600000e+01 : f32
    %76 = vector.broadcast %cst_54 : f32 to vector<1x128xf32>
    %77 = arith.divf %75, %76 : vector<1x128xf32>
    %78 = vector.broadcast %77 : vector<1x128xf32> to vector<16x128xf32>
    %79 = arith.subf %73, %78 : vector<16x128xf32>
    %80 = arith.mulf %79, %79 : vector<16x128xf32>
    %cst_55 = arith.constant dense<0.000000e+00> : vector<128xf32>
    %81 = vector.multi_reduction <add>, %80, %cst_55 [0] : vector<16x128xf32> to vector<128xf32>
    %82 = vector.shape_cast %81 : vector<128xf32> to vector<1x128xf32>
    %cst_56 = arith.constant 1.600000e+01 : f32
    %83 = vector.broadcast %cst_56 : f32 to vector<1x128xf32>
    %84 = arith.divf %82, %83 : vector<1x128xf32>
    %85 = vector.broadcast %77 : vector<1x128xf32> to vector<16x128xf32>
    %86 = arith.subf %73, %85 : vector<16x128xf32>
    %cst_57 = arith.constant 9.99999974E-6 : f32
    %87 = vector.broadcast %cst_57 : f32 to vector<1x128xf32>
    %88 = arith.addf %84, %87 : vector<1x128xf32>
    %89 = math.rsqrt %88 : vector<1x128xf32>
    %90 = vector.broadcast %89 : vector<1x128xf32> to vector<16x128xf32>
    %91 = arith.mulf %86, %90 : vector<16x128xf32>
    %c1_58 = arith.constant 1 : index
    %c0_59 = arith.constant 0 : index
    %c0_60 = arith.constant 0 : index
    %92 = vector.load %arg7[%c1_58, %c0_59, %c0_60] : memref<3x1x128xf32, #tpu.memory_space<vmem>>, vector<1x1x128xf32>
    %93 = vector.shape_cast %92 : vector<1x1x128xf32> to vector<1x128xf32>
    %94 = vector.broadcast %93 : vector<1x128xf32> to vector<16x128xf32>
    %95 = arith.mulf %91, %94 : vector<16x128xf32>
    %c1_61 = arith.constant 1 : index
    %c0_62 = arith.constant 0 : index
    %c0_63 = arith.constant 0 : index
    %96 = vector.load %arg8[%c1_61, %c0_62, %c0_63] : memref<3x1x128xf32, #tpu.memory_space<vmem>>, vector<1x1x128xf32>
    %97 = vector.shape_cast %96 : vector<1x1x128xf32> to vector<1x128xf32>
    %98 = vector.broadcast %97 : vector<1x128xf32> to vector<16x128xf32>
    %99 = arith.addf %95, %98 : vector<16x128xf32>
    %c0_64 = arith.constant 0 : index
    %c128 = arith.constant 128 : index
    %100 = vector.load %arg9[%c0_64, %c128] : memref<16x384xf32, #tpu.memory_space<vmem>>, vector<16x128xf32>
    tpu.vector_store %arg9[%c0_64, %c128], %99 {strides = array<i32>} : memref<16x384xf32, #tpu.memory_space<vmem>>, vector<16x128xf32>,
    %cst_65 = arith.constant dense<0.000000e+00> : vector<2x128xf32>
    %101 = tpu.matmul %3, %99, %cst_65 {dimension_numbers = #tpu.dot_dimension_numbers<[1], [0], [0], [1], [0, 0, 1, 1], [], []>} : vector<2x16xf32>, vector<16x128xf32>, vector<2x128xf32> -> vector<2x128xf32>
    %c0_66 = arith.constant 0 : index
    %c128_67 = arith.constant 128 : index
    %102 = vector.load %arg10[%c0_66, %c128_67] : memref<2x384xf32, #tpu.memory_space<vmem>>, vector<2x128xf32>
    tpu.vector_store %arg10[%c0_66, %c128_67], %101 {strides = array<i32>} : memref<2x384xf32, #tpu.memory_space<vmem>>, vector<2x128xf32>,
    %cst_68 = arith.constant dense<0.000000e+00> : vector<16x128xf32>
    %103 = tpu.matmul %1, %99, %cst_68 {dimension_numbers = #tpu.dot_dimension_numbers<[1], [0], [0], [1], [0, 0, 1, 1], [], []>} : vector<16x16xf32>, vector<16x128xf32>, vector<16x128xf32> -> vector<16x128xf32>
    %104 = arith.addf %99, %103 : vector<16x128xf32>
    %c2 = arith.constant 2 : index
    %c0_69 = arith.constant 0 : index
    %c0_70 = arith.constant 0 : index
    %105 = vector.load %arg3[%c2, %c0_69, %c0_70] : memref<3x128x128xf32, #tpu.memory_space<vmem>>, vector<1x128x128xf32>
    %106 = vector.shape_cast %105 : vector<1x128x128xf32> to vector<128x128xf32>
    %cst_71 = arith.constant dense<0.000000e+00> : vector<16x128xf32>
    %107 = tpu.matmul %104, %106, %cst_71 {dimension_numbers = #tpu.dot_dimension_numbers<[1], [0], [0], [1], [0, 0, 1, 1], [], []>} : vector<16x128xf32>, vector<128x128xf32>, vector<16x128xf32> -> vector<16x128xf32>
    %c2_72 = arith.constant 2 : index
    %c0_73 = arith.constant 0 : index
    %c0_74 = arith.constant 0 : index
    %108 = vector.load %arg4[%c2_72, %c0_73, %c0_74] : memref<3x1x128xf32, #tpu.memory_space<vmem>>, vector<1x1x128xf32>
    %109 = vector.shape_cast %108 : vector<1x1x128xf32> to vector<1x128xf32>
    %110 = vector.broadcast %109 : vector<1x128xf32> to vector<16x128xf32>
    %111 = arith.addf %107, %110 : vector<16x128xf32>
    %cst_75 = arith.constant 0.000000e+00 : f32
    %112 = vector.broadcast %cst_75 : f32 to vector<16x128xf32>
    %113 = arith.maximumf %111, %112 : vector<16x128xf32>
    %c2_76 = arith.constant 2 : index
    %c0_77 = arith.constant 0 : index
    %c0_78 = arith.constant 0 : index
    %114 = vector.load %arg5[%c2_76, %c0_77, %c0_78] : memref<3x128x128xf32, #tpu.memory_space<vmem>>, vector<1x128x128xf32>
    %115 = vector.shape_cast %114 : vector<1x128x128xf32> to vector<128x128xf32>
    %cst_79 = arith.constant dense<0.000000e+00> : vector<16x128xf32>
    %116 = tpu.matmul %113, %115, %cst_79 {dimension_numbers = #tpu.dot_dimension_numbers<[1], [0], [0], [1], [0, 0, 1, 1], [], []>} : vector<16x128xf32>, vector<128x128xf32>, vector<16x128xf32> -> vector<16x128xf32>
    %c2_80 = arith.constant 2 : index
    %c0_81 = arith.constant 0 : index
    %c0_82 = arith.constant 0 : index
    %117 = vector.load %arg6[%c2_80, %c0_81, %c0_82] : memref<3x1x128xf32, #tpu.memory_space<vmem>>, vector<1x1x128xf32>
    %118 = vector.shape_cast %117 : vector<1x1x128xf32> to vector<1x128xf32>
    %119 = vector.broadcast %118 : vector<1x128xf32> to vector<16x128xf32>
    %120 = arith.addf %116, %119 : vector<16x128xf32>
    %cst_83 = arith.constant 0.000000e+00 : f32
    %121 = vector.broadcast %cst_83 : f32 to vector<16x128xf32>
    %122 = arith.maximumf %120, %121 : vector<16x128xf32>
    %cst_84 = arith.constant dense<0.000000e+00> : vector<128xf32>
    %123 = vector.multi_reduction <add>, %122, %cst_84 [0] : vector<16x128xf32> to vector<128xf32>
    %124 = vector.shape_cast %123 : vector<128xf32> to vector<1x128xf32>
    %cst_85 = arith.constant 1.600000e+01 : f32
    %125 = vector.broadcast %cst_85 : f32 to vector<1x128xf32>
    %126 = arith.divf %124, %125 : vector<1x128xf32>
    %127 = vector.broadcast %126 : vector<1x128xf32> to vector<16x128xf32>
    %128 = arith.subf %122, %127 : vector<16x128xf32>
    %129 = arith.mulf %128, %128 : vector<16x128xf32>
    %cst_86 = arith.constant dense<0.000000e+00> : vector<128xf32>
    %130 = vector.multi_reduction <add>, %129, %cst_86 [0] : vector<16x128xf32> to vector<128xf32>
    %131 = vector.shape_cast %130 : vector<128xf32> to vector<1x128xf32>
    %cst_87 = arith.constant 1.600000e+01 : f32
    %132 = vector.broadcast %cst_87 : f32 to vector<1x128xf32>
    %133 = arith.divf %131, %132 : vector<1x128xf32>
    %134 = vector.broadcast %126 : vector<1x128xf32> to vector<16x128xf32>
    %135 = arith.subf %122, %134 : vector<16x128xf32>
    %cst_88 = arith.constant 9.99999974E-6 : f32
    %136 = vector.broadcast %cst_88 : f32 to vector<1x128xf32>
    %137 = arith.addf %133, %136 : vector<1x128xf32>
    %138 = math.rsqrt %137 : vector<1x128xf32>
    %139 = vector.broadcast %138 : vector<1x128xf32> to vector<16x128xf32>
    %140 = arith.mulf %135, %139 : vector<16x128xf32>
    %c2_89 = arith.constant 2 : index
    %c0_90 = arith.constant 0 : index
    %c0_91 = arith.constant 0 : index
    %141 = vector.load %arg7[%c2_89, %c0_90, %c0_91] : memref<3x1x128xf32, #tpu.memory_space<vmem>>, vector<1x1x128xf32>
    %142 = vector.shape_cast %141 : vector<1x1x128xf32> to vector<1x128xf32>
    %143 = vector.broadcast %142 : vector<1x128xf32> to vector<16x128xf32>
    %144 = arith.mulf %140, %143 : vector<16x128xf32>
    %c2_92 = arith.constant 2 : index
    %c0_93 = arith.constant 0 : index
    %c0_94 = arith.constant 0 : index
    %145 = vector.load %arg8[%c2_92, %c0_93, %c0_94] : memref<3x1x128xf32, #tpu.memory_space<vmem>>, vector<1x1x128xf32>
    %146 = vector.shape_cast %145 : vector<1x1x128xf32> to vector<1x128xf32>
    %147 = vector.broadcast %146 : vector<1x128xf32> to vector<16x128xf32>
    %148 = arith.addf %144, %147 : vector<16x128xf32>
    %c0_95 = arith.constant 0 : index
    %c256 = arith.constant 256 : index
    %149 = vector.load %arg9[%c0_95, %c256] : memref<16x384xf32, #tpu.memory_space<vmem>>, vector<16x128xf32>
    tpu.vector_store %arg9[%c0_95, %c256], %148 {strides = array<i32>} : memref<16x384xf32, #tpu.memory_space<vmem>>, vector<16x128xf32>,
    %cst_96 = arith.constant dense<0.000000e+00> : vector<2x128xf32>
    %150 = tpu.matmul %3, %148, %cst_96 {dimension_numbers = #tpu.dot_dimension_numbers<[1], [0], [0], [1], [0, 0, 1, 1], [], []>} : vector<2x16xf32>, vector<16x128xf32>, vector<2x128xf32> -> vector<2x128xf32>
    %c0_97 = arith.constant 0 : index
    %c256_98 = arith.constant 256 : index
    %151 = vector.load %arg10[%c0_97, %c256_98] : memref<2x384xf32, #tpu.memory_space<vmem>>, vector<2x128xf32>
    tpu.vector_store %arg10[%c0_97, %c256_98], %150 {strides = array<i32>} : memref<2x384xf32, #tpu.memory_space<vmem>>, vector<2x128xf32>,
    return
  }
}

</mosaic_0001>

<bundles_post_ra>
// kernel: gconv_forward.1
= control target key start
LH: loop header
LB: loop body
LE: loop exit
PB: predicated region body
PF: predicated region fallthrough
CT: control target
= control target key end

     0   :  { %vm42_vm0 = vcmask 130048   ;;  %vm1950_vm1 = vmmov 0   ;;  %s2431_s2 = inlined_call_operand.vmem [shape: f32[16,128], index: 2, kind: input, shape index: {}]   ;;  %s2432_s0 = inlined_call_operand.vmem [shape: bf16[16,16], index: 0, kind: input, shape index: {}]   ;;  %s2433_s3 = inlined_call_operand.vmem [shape: f32[3,128,128], index: 3, kind: input, shape index: {}]   ;;  %s2434_s5 = inlined_call_operand.vmem [shape: f32[3,128,128], index: 5, kind: input, shape index: {}]   ;;  %s2435_s4 = inlined_call_operand.vmem [shape: f32[3,1,128], index: 4, kind: input, shape index: {}]   ;;  %s2436_s6 = inlined_call_operand.vmem [shape: f32[3,1,128], index: 6, kind: input, shape index: {}]   ;;  %s2437_s7 = inlined_call_operand.vmem [shape: f32[3,1,128], index: 7, kind: input, shape index: {}]   ;;  %s2438_s8 = inlined_call_operand.vmem [shape: f32[3,1,128], index: 8, kind: input, shape index: {}]   ;;  %s2439_s1 = inlined_call_operand.vmem [shape: bf16[2,16], index: 1, kind: input, shape index: {}]   ;;  %s2440_s9 = inlined_call_operand.vmem [shape: f32[16,384], index: 9, kind: output, shape index: {0}]   ;;  %s2441_s10 = inlined_call_operand.vmem [shape: f32[2,384], index: 10, kind: output, shape index: {1}]  }
   0x1   :  { %v2010_v0 = vld [vmem:[%s2431_s2] sm:$0xff]  ;;  %v2015_v1 = vld [vmem:[%s2431_s2 + $0x8] sm:$0xff]  ;;  %v128_v7 = vld [vmem:[%s2433_s3 + $0x10] sm:$0xff] }
   0x2   :  { %v1343_v2 = vld [vmem:[%s2432_s0] sm:$0xff]   ;;  %v1727_v3 = vpack.c.bf16 %v2015_v1, %v2010_v0  ;;  %v127_v6 = vld [vmem:[%s2433_s3 + $0x8] sm:$0xff]  ;;  %v129_v9 = vld [vmem:[%s2433_s3 + $0x18] sm:$0xff] }
   0x3   :  { %v2022_v4 = vunpack.c.l.bf16 %v1343_v2  ;;  %v126_v5 = vld [vmem:[%s2433_s3] sm:$0xff]  ;;  %v2036_v10 = vunpack.c.h.bf16 %v1343_v2  ;;  %v1735_v11 = vpack.c.bf16 %v129_v9, %v128_v7  ;;  %v131_v13 = vld [vmem:[%s2433_s3 + $0x28] sm:$0xff]  ;;  %v132_v15 = vld [vmem:[%s2433_s3 + $0x30] sm:$0xff]  ;;  %v1951_v2 = vmov 0.0  }
   0x4   :  { %v1731_v8 = vpack.c.bf16 %v127_v6, %v126_v5  ;;  %1728 = vmatprep.subr.bf16.mxu0 %v1727_v3  ;;  %v130_v12 = vld [vmem:[%s2433_s3 + $0x20] sm:$0xff]  ;;  %v133_v16 = vld [vmem:[%s2433_s3 + $0x38] sm:$0xff]  ;;  %v135_v19 = vld [vmem:[%s2433_s3 + $0x48] sm:$0xff] }
   0x5   :  { %1479 = vmatprep.mubr.msk.f32.mxu0 %vm42_vm0, %v2022_v4  ;;  %1730 = vmatpush3.bf16.msra.mxu0 %v1727_v3  ;;  %v1739_v14 = vpack.c.bf16 %v131_v13, %v130_v12  ;;  %v1743_v17 = vpack.c.bf16 %v133_v16, %v132_v15  ;;  %v134_v18 = vld [vmem:[%s2433_s3 + $0x40] sm:$0xff]  ;;  %v136_v21 = vld [vmem:[%s2433_s3 + $0x50] sm:$0xff]  ;;  %v137_v22 = vld [vmem:[%s2433_s3 + $0x58] sm:$0xff] }
   0x6   :  { %1732 = vmatprep.subr.bf16.mxu1 %v1731_v8  ;;  %v1747_v20 = vpack.c.bf16 %v135_v19, %v134_v18  ;;  %v1751_v23 = vpack.c.bf16 %v137_v22, %v136_v21  ;;  %v138_v24 = vld [vmem:[%s2433_s3 + $0x60] sm:$0xff]  ;;  %v139_v25 = vld [vmem:[%s2433_s3 + $0x68] sm:$0xff]  ;;  %v140_v27 = vld [vmem:[%s2433_s3 + $0x70] sm:$0xff] }
   0x7   :  { %1734 = vmatpush3.bf16.msra.mxu1 %v1731_v8  ;;  %v1755_v26 = vpack.c.bf16 %v139_v25, %v138_v24  ;;  %v141_v28 = vld [vmem:[%s2433_s3 + $0x78] sm:$0xff]  ;;  %v226_v30 = vld [vmem:[%s2434_s5] sm:$0xff]  ;;  %v227_v31 = vld [vmem:[%s2434_s5 + $0x8] sm:$0xff] }
   0x8   :  { %1736 = vmatprep.subr.bf16.mxu1 %v1735_v11  ;;  %1480 = vmatmul.mubr.msk.f32.vlgmr.msra.gmra.mrb[0].mxu0 %vm42_vm0, %v2036_v10  ;;  %v1759_v29 = vpack.c.bf16 %v141_v28, %v140_v27  ;;  %v228_v32 = vld [vmem:[%s2434_s5 + $0x10] sm:$0xff]  ;;  %v1763_v33 = vpack.c.bf16 %v227_v31, %v226_v30  ;;  %v229_v34 = vld [vmem:[%s2434_s5 + $0x18] sm:$0xff]  ;;  %v230_v36 = vld [vmem:[%s2434_s5 + $0x20] sm:$0xff] }
   0x9   :  { %v1767_v35 = vpack.c.bf16 %v229_v34, %v228_v32  ;;  %v231_v37 = vld [vmem:[%s2434_s5 + $0x28] sm:$0xff]  ;;  %v232_v39 = vld [vmem:[%s2434_s5 + $0x30] sm:$0xff]  ;;  %v233_v40 = vld [vmem:[%s2434_s5 + $0x38] sm:$0xff] }
   0xa   :  { %1764 = vmatprep.subr.bf16.mxu0 %v1763_v33  ;;  %v1771_v38 = vpack.c.bf16 %v231_v37, %v230_v36  ;;  %v1775_v41 = vpack.c.bf16 %v233_v40, %v232_v39  ;;  %v234_v42 = vld [vmem:[%s2434_s5 + $0x40] sm:$0xff]  ;;  %v235_v43 = vld [vmem:[%s2434_s5 + $0x48] sm:$0xff]  ;;  %v236_v45 = vld [vmem:[%s2434_s5 + $0x50] sm:$0xff] }
   0xb   :  { %1738 = vmatpush3.bf16.msra.mxu1 %v1735_v11  ;;  %1766 = vmatpush3.bf16.msra.mxu0 %v1763_v33  ;;  %v1779_v44 = vpack.c.bf16 %v235_v43, %v234_v42  ;;  %v237_v46 = vld [vmem:[%s2434_s5 + $0x58] sm:$0xff]  ;;  %v238_v48 = vld [vmem:[%s2434_s5 + $0x60] sm:$0xff]  ;;  %v239_v49 = vld [vmem:[%s2434_s5 + $0x68] sm:$0xff] }
   0xc   :  { %1740 = vmatprep.subr.bf16.mxu1 %v1739_v14  ;;  %1768 = vmatprep.subr.bf16.mxu0 %v1767_v35  ;;  %v1783_v47 = vpack.c.bf16 %v237_v46, %v236_v45  ;;  %v1787_v50 = vpack.c.bf16 %v239_v49, %v238_v48  ;;  %v240_v55 = vld [vmem:[%s2434_s5 + $0x70] sm:$0xff]  ;;  %v241_v56 = vld [vmem:[%s2434_s5 + $0x78] sm:$0xff]  ;;  %v1251_v58 = vld [vmem:[%s2435_s4] ss:$0 sm:$0xff] }
   0xd   :  { %v1791_v57 = vpack.c.bf16 %v241_v56, %v240_v55  ;;  %v1252_v3 = vld [vmem:[%s2436_s6] ss:$0 sm:$0xff]  ;;  %v1261_v48 = vld [vmem:[%s2433_s3 + $0x98] sm:$0xff] }
   0xe   :  { %v1253_v34 = vld [vmem:[%s2437_s7] ss:$0 sm:$0xff]  ;;  %v1265_v55 = vld [vmem:[%s2433_s3 + $0xb8] sm:$0xff] }
   0xf   :  { %1742 = vmatpush3.bf16.msra.mxu1 %v1739_v14  ;;  %1770 = vmatpush3.bf16.msra.mxu0 %v1767_v35  ;;  %v1254_v37 = vld [vmem:[%s2438_s8] ss:$0 sm:$0xff] }
  0x10   :  { %1744 = vmatprep.subr.bf16.mxu1 %v1743_v17  ;;  %1772 = vmatprep.subr.bf16.mxu0 %v1771_v38  ;;  %v1258_v40 = vld [vmem:[%s2433_s3 + $0x80] sm:$0xff] }
  0x13   :  { %1746 = vmatpush3.bf16.msra.mxu1 %v1743_v17  ;;  %1774 = vmatpush3.bf16.msra.mxu0 %v1771_v38 }
  0x14   :  { %1748 = vmatprep.subr.bf16.mxu1 %v1747_v20  ;;  %1776 = vmatprep.subr.bf16.mxu0 %v1775_v41 }
  0x17   :  { %1750 = vmatpush3.bf16.msra.mxu1 %v1747_v20  ;;  %1778 = vmatpush3.bf16.msra.mxu0 %v1775_v41  ;;  %v1259_v41 = vld [vmem:[%s2433_s3 + $0x88] sm:$0xff] }
  0x18   :  { %1752 = vmatprep.subr.bf16.mxu1 %v1751_v23  ;;  %1780 = vmatprep.subr.bf16.mxu0 %v1779_v44  ;;  %v1802_v45 = vpack.c.bf16 %v1259_v41, %v1258_v40 }
  0x1b   :  { %1754 = vmatpush3.bf16.msra.mxu1 %v1751_v23  ;;  %1782 = vmatpush3.bf16.msra.mxu0 %v1779_v44  ;;  %v38_v44 = vld [vmem:[%s2439_s1] sm:$0x1] }
  0x1c   :  { %1756 = vmatprep.subr.bf16.mxu1 %v1755_v26  ;;  %1784 = vmatprep.subr.bf16.mxu0 %v1783_v47  ;;  %v2174_v49 = vunpack.c.l.bf16 %v38_v44 }
  0x1f   :  { %1758 = vmatpush3.bf16.msra.mxu1 %v1755_v26  ;;  %1786 = vmatpush3.bf16.msra.mxu0 %v1783_v47  ;;  %v1260_v47 = vld [vmem:[%s2433_s3 + $0x90] sm:$0xff] }
  0x20   :  { %1760 = vmatprep.subr.bf16.mxu1 %v1759_v29  ;;  %1788 = vmatprep.subr.bf16.mxu0 %v1787_v50 }
  0x23   :  { %1762 = vmatpush3.bf16.msra.mxu1 %v1759_v29  ;;  %1790 = vmatpush3.bf16.msra.mxu0 %v1787_v50  ;;  %v1806_v50 = vpack.c.bf16 %v1261_v48, %v1260_v47 }
  0x24   :  { %1792 = vmatprep.subr.bf16.mxu0 %v1791_v57 }
  0x27   :  { %1794 = vmatpush3.bf16.msra.mxu0 %v1791_v57  ;;  %v1266_v57 = vld [vmem:[%s2433_s3 + $0xc0] sm:$0xff] }
  0xdb   :  { %v1481_v51 = vpop.f32.mrb[0].mxu0 }
  0xdc   :  { %v115_v52 = vpop.f32.mrb[1].mxu0  ;;  %v125_v54 = vadd.f32 %v1481_v51, %v2015_v1  ;;  %v1949_v1 = vmov 0.0|0.0   ;;  %v1262_v51 = vld [vmem:[%s2433_s3 + $0xa0] sm:$0xff] }
  0xdd   :  { %v124_v53 = vadd.f32 %v115_v52, %v2010_v0  ;;  %1795 = vmatprep.subr.bf16.mxu1 %v1949_v1  ;;  %v1263_v52 = vld [vmem:[%s2433_s3 + $0xa8] sm:$0xff] }
  0xdf   :  { %1514 = vmatprep.mubr.f32.mxu1 %v124_v53  ;;  %v1810_v53 = vpack.c.bf16 %v1263_v52, %v1262_v51 }
  0xe0   :  { %1515 = vmatmul.mubr.f32.vlgmr.msra.gmra.mrb[0].mxu1 %v125_v54  ;;  %v1264_v54 = vld [vmem:[%s2433_s3 + $0xb0] sm:$0xff] }
  0xe1   :  { %1556 = vmatprep.mubr.msk.f32.mxu1 %vm1950_vm1, %v1951_v2  ;;  %v1814_v56 = vpack.c.bf16 %v1265_v55, %v1264_v54 }
 0x1b3   :  { %v1516_v59 = vpop.f32.mrb[0].mxu1 }
 0x1b4   :  { %v221_v60 = vadd.f32 %v1516_v59, %v1251_v58  ;;  %v215_v61 = vpop.f32.mrb[1].mxu1 }
 0x1b5   :  { %v216_v62 = vadd.f32 %v1251_v58, %v215_v61  ;;  %v1267_v58 = vld [vmem:[%s2433_s3 + $0xc8] sm:$0xff]  ;;  %v1269_v61 = vld [vmem:[%s2433_s3 + $0xd8] sm:$0xff] }
 0x1b6   :  { %v225_v0 = vmax.f32 %v221_v60, 0.0  ;;  %v1818_v59 = vpack.c.bf16 %v1267_v58, %v1266_v57  ;;  %v1268_v60 = vld [vmem:[%s2433_s3 + $0xd0] sm:$0xff] }
 0x1b7   :  { %v224_v63 = vmax.f32 %v216_v62, 0.0  ;;  %v1822_v62 = vpack.c.bf16 %v1269_v61, %v1268_v60 }
 0x1b9   :  { %1549 = vmatprep.mubr.f32.mxu0 %v224_v63  ;;  %v1270_v63 = vld [vmem:[%s2433_s3 + $0xe0] sm:$0xff] }
 0x1ba   :  { %1550 = vmatmul.mubr.f32.vlgmr.msra.gmra.mrb[2].mxu0 %v225_v0  ;;  %v1271_v0 = vld [vmem:[%s2433_s3 + $0xe8] sm:$0xff] }
 0x1bb   :  { %1563 = vmatprep.mubr.msk.f32.mxu0 %vm42_vm0, %v2022_v4 }
 0x28d   :  { %v1551_v5 = vpop.f32.mrb[2].mxu0 }
 0x28e   :  { %v321_v6 = vadd.f32 %v1551_v5, %v1252_v3  ;;  %v315_v7 = vpop.f32.mrb[3].mxu0  ;;  %v1272_v5 = vld [vmem:[%s2433_s3 + $0xf0] sm:$0xff] }
 0x28f   :  { %v316_v8 = vadd.f32 %v1252_v3, %v315_v7  ;;  %v1826_v3 = vpack.c.bf16 %v1271_v0, %v1270_v63 }
 0x290   :  { %v325_v9 = vmax.f32 %v321_v6, 0.0  ;;  %v1273_v6 = vld [vmem:[%s2433_s3 + $0xf8] sm:$0xff] }
 0x291   :  { %v324_v11 = vmax.f32 %v316_v8, 0.0  ;;  %v1830_v7 = vpack.c.bf16 %v1273_v6, %v1272_v5  ;;  %v1276_v8 = vld [vmem:[%s2434_s5 + $0x80] sm:$0xff] }
 0x293   :  { %v326_v12 = vadd.f32 %v325_v9, %v324_v11 }
 0x295   :  { %v327_v13 = vrot.slane %v326_v12, 4 }
 0x297   :  { %v328_v14 = vadd.f32 %v327_v13, %v326_v12  ;;  %v1279_v13 = vld [vmem:[%s2434_s5 + $0x98] sm:$0xff] }
 0x299   :  { %v329_v15 = vrot.slane %v328_v14, 2 }
 0x29b   :  { %v330_v16 = vadd.f32 %v329_v15, %v328_v14  ;;  %v1280_v15 = vld [vmem:[%s2434_s5 + $0xa0] sm:$0xff] }
 0x29d   :  { %v331_v17 = vrot.slane %v330_v16, 1 }
 0x29f   :  { %v332_v18 = vadd.f32 %v331_v17, %v330_v16  ;;  %v1281_v16 = vld [vmem:[%s2434_s5 + $0xa8] sm:$0xff] }
 0x2a0   :  { %v1842_v17 = vpack.c.bf16 %v1281_v16, %v1280_v15  ;;  %v1295_v15 = vld [vmem:[%s2437_s7 + $0x1] ss:$0 sm:$0xff] }
 0x2a1   :  { %v334_v19 = vmul.f32 0.0625, %v332_v18  ;;  %v1282_v18 = vld [vmem:[%s2434_s5 + $0xb0] sm:$0xff] }
 0x2a3   :  { %v335_v20 = vsub.f32 %v324_v11, %v334_v19  ;;  %v336_v21 = vsub.f32 %v325_v9, %v334_v19  ;;  %v1277_v9 = vld [vmem:[%s2434_s5 + $0x88] sm:$0xff]  ;;  %v1278_v11 = vld [vmem:[%s2434_s5 + $0x90] sm:$0xff]  ;;  %v1283_v19 = vld [vmem:[%s2434_s5 + $0xb8] sm:$0xff] }
 0x2a4   :  { %v1834_v12 = vpack.c.bf16 %v1277_v9, %v1276_v8  ;;  %v1838_v14 = vpack.c.bf16 %v1279_v13, %v1278_v11 }
 0x2a5   :  { %v337_v22 = vmul.f32 %v335_v20, %v335_v20  ;;  %v338_v23 = vmul.f32 %v336_v21, %v336_v21 }
 0x2a7   :  { %v339_v24 = vadd.f32 %v338_v23, %v337_v22  ;;  %v1285_v22 = vld [vmem:[%s2434_s5 + $0xc8] sm:$0xff] }
 0x2a9   :  { %v340_v25 = vrot.slane %v339_v24, 4 }
 0x2ab   :  { %v341_v26 = vadd.f32 %v340_v25, %v339_v24  ;;  %v1286_v24 = vld [vmem:[%s2434_s5 + $0xd0] sm:$0xff]  ;;  %v1287_v25 = vld [vmem:[%s2434_s5 + $0xd8] sm:$0xff] }
 0x2ad   :  { %v342_v27 = vrot.slane %v341_v26, 2 }
 0x2af   :  { %v343_v28 = vadd.f32 %v342_v27, %v341_v26  ;;  %v1854_v26 = vpack.c.bf16 %v1287_v25, %v1286_v24  ;;  %v1288_v27 = vld [vmem:[%s2434_s5 + $0xe0] sm:$0xff] }
 0x2b1   :  { %v344_v29 = vrot.slane %v343_v28, 1 }
 0x2b3   :  { %v345_v30 = vadd.f32 %v344_v29, %v343_v28  ;;  %v1289_v28 = vld [vmem:[%s2434_s5 + $0xe8] sm:$0xff] }
 0x2b4   :  { %v1858_v29 = vpack.c.bf16 %v1289_v28, %v1288_v27  ;;  %v1303_v27 = vld [vmem:[%s2433_s3 + $0x110] sm:$0xff]  ;;  %v1304_v28 = vld [vmem:[%s2433_s3 + $0x118] sm:$0xff] }
 0x2b5   :  { %v346_v31 = vmul.f32 0.0625, %v345_v30 }
 0x2b7   :  { %v347_v32 = vadd.f32 1e-05, %v346_v31 }
 0x2b9   :  { %1943 = vrsqrt.f32 %v347_v32 }
 0x2c3   :  { %v1944_v33 = vpop.eup %1943 }
 0x2c4   :  { %v349_v35 = vmul.f32 %v1944_v33, %v335_v20  ;;  %v350_v36 = vmul.f32 %v1944_v33, %v336_v21  ;;  %v1846_v20 = vpack.c.bf16 %v1283_v19, %v1282_v18  ;;  %v1284_v21 = vld [vmem:[%s2434_s5 + $0xc0] sm:$0xff] }
 0x2c5   :  { %v1850_v23 = vpack.c.bf16 %v1285_v22, %v1284_v21  ;;  %v1297_v18 = vld [vmem:[%s2438_s8 + $0x1] ss:$0 sm:$0xff]  ;;  %v1302_v22 = vld [vmem:[%s2433_s3 + $0x108] sm:$0xff] }
 0x2c6   :  { %v358_v38 = vmul.f32 %v1253_v34, %v349_v35  ;;  %v359_v39 = vmul.f32 %v1253_v34, %v350_v36  ;;  %v1290_v36 = vld [vmem:[%s2434_s5 + $0xf0] sm:$0xff]  ;;  %v1301_v21 = vld [vmem:[%s2433_s3 + $0x100] sm:$0xff] }
 0x2c7   :  { %v1873_v25 = vpack.c.bf16 %v1302_v22, %v1301_v21  ;;  %v1336_v22 = vld [vmem:[%s2436_s6 + $0x2] ss:$0 sm:$0xff] }
 0x2c8   :  { %v2151_v42 = vadd.f32 %v1254_v37, %v358_v38  ;;  %v2153_v43 = vadd.f32 %v1254_v37, %v359_v39  ;;  %v1291_v37 = vld [vmem:[%s2434_s5 + $0xf8] sm:$0xff]  ;;  %v1275_v39 = vld [vmem:[%s2435_s4 + $0x1] ss:$0 sm:$0xff] }
 0x2c9   :  { %v1862_v38 = vpack.c.bf16 %v1291_v37, %v1290_v36  ;;  %v1309_v36 = vld [vmem:[%s2433_s3 + $0x140] sm:$0xff] }
 0x2ca   :  { %369 = vst [vmem:[%s2440_s9] sm:$0xff] %v2151_v42  ;;  %370 = vst [vmem:[%s2440_s9 + $0x18] sm:$0xff] %v2153_v43  ;;  %v1796_v46 = vpack.c.bf16 %v2153_v43, %v2151_v42 }
 0x2cc   :  { %1797 = vmatpush3.bf16.msra.mxu1 %v1796_v46  ;;  %1799 = vmatprep.subr.bf16.mxu0 %v1796_v46 }
 0x2cd   :  { %1801 = vmatpush3.bf16.msra.mxu0 %v1796_v46  ;;  %1803 = vmatprep.subr.bf16.mxu1 %v1802_v45  ;;  %v1293_v46 = vld [vmem:[%s2436_s6 + $0x1] ss:$0 sm:$0xff] }
 0x2ce   :  { %1835 = vmatprep.subr.bf16.mxu0 %v1834_v12 }
 0x2cf   :  { %1557 = vmatmul.mubr.msk.f32.vlgmr.msra.gmra.mrb[2].mxu1 %vm42_vm0, %v2174_v49 }
 0x2d0   :  { %1564 = vmatmul.mubr.msk.f32.vlgmr.msra.gmra.mrb[4].mxu0 %vm42_vm0, %v2036_v10  ;;  %1805 = vmatpush3.bf16.msra.mxu1 %v1802_v45 }
 0x2d1   :  { %1807 = vmatprep.subr.bf16.mxu1 %v1806_v50  ;;  %1837 = vmatpush3.bf16.msra.mxu0 %v1834_v12 }
 0x2d2   :  { %1839 = vmatprep.subr.bf16.mxu0 %v1838_v14 }
 0x2d4   :  { %1809 = vmatpush3.bf16.msra.mxu1 %v1806_v50 }
 0x2d5   :  { %1811 = vmatprep.subr.bf16.mxu1 %v1810_v53  ;;  %1841 = vmatpush3.bf16.msra.mxu0 %v1838_v14 }
 0x2d6   :  { %1843 = vmatprep.subr.bf16.mxu0 %v1842_v17 }
 0x2d8   :  { %1813 = vmatpush3.bf16.msra.mxu1 %v1810_v53 }
 0x2d9   :  { %1815 = vmatprep.subr.bf16.mxu1 %v1814_v56  ;;  %1845 = vmatpush3.bf16.msra.mxu0 %v1842_v17 }
 0x2da   :  { %1847 = vmatprep.subr.bf16.mxu0 %v1846_v20 }
 0x2dc   :  { %1817 = vmatpush3.bf16.msra.mxu1 %v1814_v56 }
 0x2dd   :  { %1819 = vmatprep.subr.bf16.mxu1 %v1818_v59  ;;  %1849 = vmatpush3.bf16.msra.mxu0 %v1846_v20 }
 0x2de   :  { %1851 = vmatprep.subr.bf16.mxu0 %v1850_v23 }
 0x2e0   :  { %1821 = vmatpush3.bf16.msra.mxu1 %v1818_v59 }
 0x2e1   :  { %1823 = vmatprep.subr.bf16.mxu1 %v1822_v62  ;;  %1853 = vmatpush3.bf16.msra.mxu0 %v1850_v23 }
 0x2e2   :  { %1855 = vmatprep.subr.bf16.mxu0 %v1854_v26 }
 0x2e4   :  { %1825 = vmatpush3.bf16.msra.mxu1 %v1822_v62 }
 0x2e5   :  { %1827 = vmatprep.subr.bf16.mxu1 %v1826_v3  ;;  %1857 = vmatpush3.bf16.msra.mxu0 %v1854_v26 }
 0x2e6   :  { %1859 = vmatprep.subr.bf16.mxu0 %v1858_v29 }
 0x2e8   :  { %1829 = vmatpush3.bf16.msra.mxu1 %v1826_v3 }
 0x2e9   :  { %1831 = vmatprep.subr.bf16.mxu1 %v1830_v7  ;;  %1861 = vmatpush3.bf16.msra.mxu0 %v1858_v29  ;;  %v1877_v29 = vpack.c.bf16 %v1304_v28, %v1303_v27 }
 0x2ea   :  { %1863 = vmatprep.subr.bf16.mxu0 %v1862_v38 }
 0x2ec   :  { %1833 = vmatpush3.bf16.msra.mxu1 %v1830_v7 }
 0x2ed   :  { %1866 = vmatprep.subr.bf16.mxu1 %v1949_v1  ;;  %1865 = vmatpush3.bf16.msra.mxu0 %v1862_v38  ;;  %v1311_v38 = vld [vmem:[%s2433_s3 + $0x150] sm:$0xff] }
 0x3a2   :  { %v440_v30 = vpop.f32.mrb[2].mxu1 }
 0x3a3   :  { %v1565_v31 = vpop.f32.mrb[4].mxu0  ;;  %444 = vst [vmem:[%s2441_s10] sm:$0x3] %v440_v30  ;;  %v1558_v32 = vpop.f32.mrb[3].mxu1  ;;  %v1305_v30 = vld [vmem:[%s2433_s3 + $0x120] sm:$0xff] }
 0x3a4   :  { %v511_v33 = vpop.f32.mrb[5].mxu0  ;;  %v521_v35 = vadd.f32 %v1565_v31, %v2153_v43  ;;  %v1306_v31 = vld [vmem:[%s2433_s3 + $0x128] sm:$0xff] }
 0x3a5   :  { %v520_v34 = vadd.f32 %v511_v33, %v2151_v42  ;;  %v1881_v32 = vpack.c.bf16 %v1306_v31, %v1305_v30  ;;  %v1307_v33 = vld [vmem:[%s2433_s3 + $0x130] sm:$0xff] }
 0x3a7   :  { %1598 = vmatprep.mubr.f32.mxu1 %v520_v34  ;;  %v1308_v34 = vld [vmem:[%s2433_s3 + $0x138] sm:$0xff] }
 0x3a8   :  { %1599 = vmatmul.mubr.f32.vlgmr.msra.gmra.mrb[4].mxu1 %v521_v35  ;;  %v1885_v35 = vpack.c.bf16 %v1308_v34, %v1307_v33 }
 0x3a9   :  { %1640 = vmatprep.mubr.msk.f32.mxu1 %vm1950_vm1, %v1951_v2 }
 0x47b   :  { %v1600_v40 = vpop.f32.mrb[4].mxu1 }
 0x47c   :  { %v619_v41 = vadd.f32 %v1600_v40, %v1275_v39  ;;  %v613_v42 = vpop.f32.mrb[5].mxu1 }
 0x47d   :  { %v614_v43 = vadd.f32 %v1275_v39, %v613_v42  ;;  %v1312_v39 = vld [vmem:[%s2433_s3 + $0x158] sm:$0xff]  ;;  %v1314_v42 = vld [vmem:[%s2433_s3 + $0x168] sm:$0xff] }
 0x47e   :  { %v623_v45 = vmax.f32 %v619_v41, 0.0  ;;  %v1893_v40 = vpack.c.bf16 %v1312_v39, %v1311_v38  ;;  %v1313_v41 = vld [vmem:[%s2433_s3 + $0x160] sm:$0xff] }
 0x47f   :  { %v622_v44 = vmax.f32 %v614_v43, 0.0  ;;  %v1897_v43 = vpack.c.bf16 %v1314_v42, %v1313_v41 }
 0x481   :  { %1633 = vmatprep.mubr.f32.mxu0 %v622_v44  ;;  %v1315_v44 = vld [vmem:[%s2433_s3 + $0x170] sm:$0xff] }
 0x482   :  { %1634 = vmatmul.mubr.f32.vlgmr.msra.gmra.mrb[6].mxu0 %v623_v45  ;;  %v1316_v45 = vld [vmem:[%s2433_s3 + $0x178] sm:$0xff] }
 0x483   :  { %1647 = vmatprep.mubr.msk.f32.mxu0 %vm42_vm0, %v2022_v4 }
 0x555   :  { %v1635_v47 = vpop.f32.mrb[6].mxu0 }
 0x556   :  { %v721_v48 = vadd.f32 %v1635_v47, %v1293_v46  ;;  %v715_v50 = vpop.f32.mrb[7].mxu0  ;;  %v1319_v47 = vld [vmem:[%s2434_s5 + $0x100] sm:$0xff] }
 0x557   :  { %v716_v51 = vadd.f32 %v1293_v46, %v715_v50  ;;  %v1901_v46 = vpack.c.bf16 %v1316_v45, %v1315_v44  ;;  %v1321_v50 = vld [vmem:[%s2434_s5 + $0x110] sm:$0xff] }
 0x558   :  { %v725_v52 = vmax.f32 %v721_v48, 0.0  ;;  %v1320_v48 = vld [vmem:[%s2434_s5 + $0x108] sm:$0xff] }
 0x559   :  { %v724_v53 = vmax.f32 %v716_v51, 0.0  ;;  %v1905_v51 = vpack.c.bf16 %v1320_v48, %v1319_v47 }
 0x55b   :  { %v726_v54 = vadd.f32 %v725_v52, %v724_v53 }
 0x55d   :  { %v727_v55 = vrot.slane %v726_v54, 4 }
 0x55f   :  { %v728_v56 = vadd.f32 %v727_v55, %v726_v54  ;;  %v1324_v54 = vld [vmem:[%s2434_s5 + $0x128] sm:$0xff] }
 0x561   :  { %v729_v57 = vrot.slane %v728_v56, 2 }
 0x563   :  { %v730_v58 = vadd.f32 %v729_v57, %v728_v56  ;;  %v1325_v56 = vld [vmem:[%s2434_s5 + $0x130] sm:$0xff]  ;;  %v1326_v57 = vld [vmem:[%s2434_s5 + $0x138] sm:$0xff] }
 0x565   :  { %v731_v59 = vrot.slane %v730_v58, 1 }
 0x567   :  { %v732_v60 = vadd.f32 %v731_v59, %v730_v58  ;;  %v1917_v58 = vpack.c.bf16 %v1326_v57, %v1325_v56  ;;  %v1327_v59 = vld [vmem:[%s2434_s5 + $0x140] sm:$0xff] }
 0x569   :  { %v733_v61 = vmul.f32 0.0625, %v732_v60  ;;  %v1328_v60 = vld [vmem:[%s2434_s5 + $0x148] sm:$0xff] }
 0x56b   :  { %v734_v62 = vsub.f32 %v724_v53, %v733_v61  ;;  %v735_v4 = vsub.f32 %v725_v52, %v733_v61  ;;  %v1322_v52 = vld [vmem:[%s2434_s5 + $0x118] sm:$0xff]  ;;  %v1921_v61 = vpack.c.bf16 %v1328_v60, %v1327_v59 }
 0x56c   :  { %v1909_v53 = vpack.c.bf16 %v1322_v52, %v1321_v50 }
 0x56d   :  { %v736_v63 = vmul.f32 %v734_v62, %v734_v62  ;;  %v737_v0 = vmul.f32 %v735_v4, %v735_v4 }
 0x56f   :  { %v738_v3 = vadd.f32 %v737_v0, %v736_v63  ;;  %v1331_v0 = vld [vmem:[%s2434_s5 + $0x160] sm:$0xff] }
 0x571   :  { %v739_v5 = vrot.slane %v738_v3, 4 }
 0x573   :  { %v740_v6 = vadd.f32 %v739_v5, %v738_v3  ;;  %v1332_v3 = vld [vmem:[%s2434_s5 + $0x168] sm:$0xff] }
 0x574   :  { %v1929_v5 = vpack.c.bf16 %v1332_v3, %v1331_v0 }
 0x575   :  { %v741_v7 = vrot.slane %v740_v6, 2 }
 0x577   :  { %v742_v8 = vadd.f32 %v741_v7, %v740_v6 }
 0x579   :  { %v743_v9 = vrot.slane %v742_v8, 1 }
 0x57b   :  { %v744_v11 = vadd.f32 %v743_v9, %v742_v8 }
 0x57d   :  { %v745_v12 = vmul.f32 0.0625, %v744_v11 }
 0x57f   :  { %v746_v13 = vadd.f32 1e-05, %v745_v12 }
 0x581   :  { %1945 = vrsqrt.f32 %v746_v13  ;;  %v1333_v13 = vld [vmem:[%s2434_s5 + $0x170] sm:$0xff] }
 0x58b   :  { %v1946_v14 = vpop.eup %1945 }
 0x58c   :  { %v748_v16 = vmul.f32 %v1946_v14, %v734_v62  ;;  %v749_v17 = vmul.f32 %v1946_v14, %v735_v4  ;;  %v1329_v62 = vld [vmem:[%s2434_s5 + $0x150] sm:$0xff]  ;;  %v1330_v4 = vld [vmem:[%s2434_s5 + $0x158] sm:$0xff] }
 0x58d   :  { %v1925_v63 = vpack.c.bf16 %v1330_v4, %v1329_v62  ;;  %v1334_v14 = vld [vmem:[%s2434_s5 + $0x178] sm:$0xff] }
 0x58e   :  { %v758_v19 = vmul.f32 %v1295_v15, %v748_v16  ;;  %v759_v20 = vmul.f32 %v1295_v15, %v749_v17  ;;  %v1933_v15 = vpack.c.bf16 %v1334_v14, %v1333_v13  ;;  %v1318_v16 = vld [vmem:[%s2435_s4 + $0x2] ss:$0 sm:$0xff] }
 0x590   :  { %v2292_v23 = vadd.f32 %v1297_v18, %v758_v19  ;;  %v2294_v24 = vadd.f32 %v1297_v18, %v759_v20 }
 0x592   :  { %770 = vst [vmem:[%s2440_s9 + $0x8] sm:$0xff] %v2292_v23  ;;  %771 = vst [vmem:[%s2440_s9 + $0x20] sm:$0xff] %v2294_v24  ;;  %v1867_v26 = vpack.c.bf16 %v2294_v24, %v2292_v23 }
 0x594   :  { %1868 = vmatpush3.bf16.msra.mxu1 %v1867_v26  ;;  %1870 = vmatprep.subr.bf16.mxu0 %v1867_v26 }
 0x595   :  { %1872 = vmatpush3.bf16.msra.mxu0 %v1867_v26  ;;  %1874 = vmatprep.subr.bf16.mxu1 %v1873_v25 }
 0x596   :  { %1906 = vmatprep.subr.bf16.mxu0 %v1905_v51 }
 0x597   :  { %1641 = vmatmul.mubr.msk.f32.vlgmr.msra.gmra.mrb[6].mxu1 %vm42_vm0, %v2174_v49 }
 0x598   :  { %1648 = vmatmul.mubr.msk.f32.vlgmr.msra.gmra.mrb[8].mxu0 %vm42_vm0, %v2036_v10  ;;  %1876 = vmatpush3.bf16.msra.mxu1 %v1873_v25  ;;  %v1310_v10 = vld [vmem:[%s2433_s3 + $0x148] sm:$0xff] }
 0x599   :  { %1878 = vmatprep.subr.bf16.mxu1 %v1877_v29  ;;  %v1889_v37 = vpack.c.bf16 %v1310_v10, %v1309_v36  ;;  %1908 = vmatpush3.bf16.msra.mxu0 %v1905_v51  ;;  %v1338_v51 = vld [vmem:[%s2437_s7 + $0x2] ss:$0 sm:$0xff] }
 0x59a   :  { %1910 = vmatprep.subr.bf16.mxu0 %v1909_v53 }
 0x59c   :  { %1880 = vmatpush3.bf16.msra.mxu1 %v1877_v29 }
 0x59d   :  { %1882 = vmatprep.subr.bf16.mxu1 %v1881_v32  ;;  %1912 = vmatpush3.bf16.msra.mxu0 %v1909_v53 }
 0x5a0   :  { %1884 = vmatpush3.bf16.msra.mxu1 %v1881_v32 }
 0x5a1   :  { %1886 = vmatprep.subr.bf16.mxu1 %v1885_v35 }
 0x5a4   :  { %1888 = vmatpush3.bf16.msra.mxu1 %v1885_v35 }
 0x5a5   :  { %1890 = vmatprep.subr.bf16.mxu1 %v1889_v37 }
 0x5a8   :  { %1892 = vmatpush3.bf16.msra.mxu1 %v1889_v37 }
 0x5a9   :  { %1894 = vmatprep.subr.bf16.mxu1 %v1893_v40 }
 0x5ac   :  { %1896 = vmatpush3.bf16.msra.mxu1 %v1893_v40 }
 0x5ad   :  { %1898 = vmatprep.subr.bf16.mxu1 %v1897_v43 }
 0x5b0   :  { %1900 = vmatpush3.bf16.msra.mxu1 %v1897_v43 }
 0x5b1   :  { %1902 = vmatprep.subr.bf16.mxu1 %v1901_v46 }
 0x5b4   :  { %1904 = vmatpush3.bf16.msra.mxu1 %v1901_v46 }
 0x5b5   :  { %1937 = vmatprep.subr.bf16.mxu1 %v1949_v1  ;;  %v1323_v1 = vld [vmem:[%s2434_s5 + $0x120] sm:$0xff] }
 0x5b6   :  { %v1913_v55 = vpack.c.bf16 %v1324_v54, %v1323_v1  ;;  %v1340_v1 = vld [vmem:[%s2438_s8 + $0x2] ss:$0 sm:$0xff] }
 0x5b8   :  { %1914 = vmatprep.subr.bf16.mxu0 %v1913_v55 }
 0x5b9   :  { %1916 = vmatpush3.bf16.msra.mxu0 %v1913_v55 }
 0x5ba   :  { %1918 = vmatprep.subr.bf16.mxu0 %v1917_v58 }
 0x5bd   :  { %1920 = vmatpush3.bf16.msra.mxu0 %v1917_v58 }
 0x5be   :  { %1922 = vmatprep.subr.bf16.mxu0 %v1921_v61 }
 0x5c1   :  { %1924 = vmatpush3.bf16.msra.mxu0 %v1921_v61 }
 0x5c2   :  { %1926 = vmatprep.subr.bf16.mxu0 %v1925_v63 }
 0x5c5   :  { %1928 = vmatpush3.bf16.msra.mxu0 %v1925_v63 }
 0x5c6   :  { %1930 = vmatprep.subr.bf16.mxu0 %v1929_v5 }
 0x5c9   :  { %1932 = vmatpush3.bf16.msra.mxu0 %v1929_v5 }
 0x5ca   :  { %1934 = vmatprep.subr.bf16.mxu0 %v1933_v15 }
 0x5cd   :  { %1936 = vmatpush3.bf16.msra.mxu0 %v1933_v15 }
 0x66a   :  { %v838_v6 = vpop.f32.mrb[6].mxu1 }
 0x66b   :  { %v1649_v7 = vpop.f32.mrb[8].mxu0  ;;  %842 = vst [vmem:[%s2441_s10 + $0x2] sm:$0x3] %v838_v6  ;;  %v1642_v8 = vpop.f32.mrb[7].mxu1 }
 0x66c   :  { %v909_v9 = vpop.f32.mrb[9].mxu0  ;;  %v919_v12 = vadd.f32 %v1649_v7, %v2294_v24 }
 0x66d   :  { %v918_v11 = vadd.f32 %v909_v9, %v2292_v23 }
 0x66f   :  { %1682 = vmatprep.mubr.f32.mxu1 %v918_v11 }
 0x670   :  { %1683 = vmatmul.mubr.f32.vlgmr.msra.gmra.mrb[8].mxu1 %v919_v12 }
 0x671   :  { %1724 = vmatprep.mubr.msk.f32.mxu1 %vm1950_vm1, %v1951_v2 }
 0x743   :  { %v1684_v17 = vpop.f32.mrb[8].mxu1 }
 0x744   :  { %v1017_v18 = vadd.f32 %v1684_v17, %v1318_v16  ;;  %v1011_v19 = vpop.f32.mrb[9].mxu1 }
 0x745   :  { %v1012_v20 = vadd.f32 %v1318_v16, %v1011_v19 }
 0x746   :  { %v1021_v21 = vmax.f32 %v1017_v18, 0.0 }
 0x747   :  { %v1020_v2 = vmax.f32 %v1012_v20, 0.0 }
 0x749   :  { %1717 = vmatprep.mubr.f32.mxu0 %v1020_v2 }
 0x74a   :  { %1718 = vmatmul.mubr.f32.vlgmr.msra.gmra.mrb[10].mxu0 %v1021_v21 }
 0x81d   :  { %v1719_v23 = vpop.f32.mrb[10].mxu0 }
 0x81e   :  { %v1119_v24 = vadd.f32 %v1719_v23, %v1336_v22  ;;  %v1113_v25 = vpop.f32.mrb[11].mxu0 }
 0x81f   :  { %v1114_v26 = vadd.f32 %v1336_v22, %v1113_v25 }
 0x820   :  { %v1123_v27 = vmax.f32 %v1119_v24, 0.0 }
 0x821   :  { %v1122_v28 = vmax.f32 %v1114_v26, 0.0 }
 0x823   :  { %v1124_v29 = vadd.f32 %v1123_v27, %v1122_v28 }
 0x825   :  { %v1125_v30 = vrot.slane %v1124_v29, 4 }
 0x827   :  { %v1126_v31 = vadd.f32 %v1125_v30, %v1124_v29 }
 0x829   :  { %v1127_v32 = vrot.slane %v1126_v31, 2 }
 0x82b   :  { %v1128_v33 = vadd.f32 %v1127_v32, %v1126_v31 }
 0x82d   :  { %v1129_v34 = vrot.slane %v1128_v33, 1 }
 0x82f   :  { %v1130_v35 = vadd.f32 %v1129_v34, %v1128_v33 }
 0x831   :  { %v1131_v36 = vmul.f32 0.0625, %v1130_v35 }
 0x833   :  { %v1132_v10 = vsub.f32 %v1122_v28, %v1131_v36  ;;  %v1133_v37 = vsub.f32 %v1123_v27, %v1131_v36 }
 0x835   :  { %v1134_v38 = vmul.f32 %v1132_v10, %v1132_v10  ;;  %v1135_v39 = vmul.f32 %v1133_v37, %v1133_v37 }
 0x837   :  { %v1136_v40 = vadd.f32 %v1135_v39, %v1134_v38 }
 0x839   :  { %v1137_v41 = vrot.slane %v1136_v40, 4 }
 0x83b   :  { %v1138_v42 = vadd.f32 %v1137_v41, %v1136_v40 }
 0x83d   :  { %v1139_v43 = vrot.slane %v1138_v42, 2 }
 0x83f   :  { %v1140_v44 = vadd.f32 %v1139_v43, %v1138_v42 }
 0x841   :  { %v1141_v45 = vrot.slane %v1140_v44, 1 }
 0x843   :  { %v1142_v46 = vadd.f32 %v1141_v45, %v1140_v44 }
 0x845   :  { %v1143_v47 = vmul.f32 0.0625, %v1142_v46 }
 0x847   :  { %v1144_v48 = vadd.f32 1e-05, %v1143_v47 }
 0x849   :  { %1947 = vrsqrt.f32 %v1144_v48 }
 0x853   :  { %v1948_v50 = vpop.eup %1947 }
 0x854   :  { %v1146_v52 = vmul.f32 %v1948_v50, %v1132_v10  ;;  %v1147_v53 = vmul.f32 %v1948_v50, %v1133_v37 }
 0x856   :  { %v1156_v54 = vmul.f32 %v1338_v51, %v1146_v52  ;;  %v1157_v55 = vmul.f32 %v1338_v51, %v1147_v53 }
 0x858   :  { %v1166_v56 = vadd.f32 %v1340_v1, %v1156_v54  ;;  %v1167_v57 = vadd.f32 %v1340_v1, %v1157_v55 }
 0x85a   :  { %1168 = vst [vmem:[%s2440_s9 + $0x10] sm:$0xff] %v1166_v56  ;;  %1169 = vst [vmem:[%s2440_s9 + $0x28] sm:$0xff] %v1167_v57  ;;  %v1938_v58 = vpack.c.bf16 %v1167_v57, %v1166_v56 }
 0x85c   :  { %1939 = vmatpush3.bf16.msra.mxu1 %v1938_v58 }
 0x85f   :  { %1725 = vmatmul.mubr.msk.f32.vlgmr.msra.gmra.mrb[10].mxu1 %vm42_vm0, %v2174_v49 }
 0x932   :  { %v1236_v59 = vpop.f32.mrb[10].mxu1 }
 0x933   :  { %1240 = vst [vmem:[%s2441_s10 + $0x4] sm:$0x3] %v1236_v59  ;;  %v1726_v60 = vpop.f32.mrb[11].mxu1 }

</bundles_post_ra>
